<compile_context>
chip_gen: v6e
topology: v6e:2x2x1
jax: 0.10.0
libtpu: 0.0.40
codegen_flags: <defaults>
</compile_context>

<pallas_src>
import jax
import jax.numpy as jnp
from jax.experimental import pallas as pl
from jax.experimental.pallas import tpu as pltpu

NUM_LAYERS = 5
HIDDEN = 50
OUTPUT = 2
INPUT = 1
LN_EPS = 1e-5
PAD = 128            # lane-padded feature width
MAX_BATCH_TILE = 512 # rows per grid step for large batches


def _mlp_kernel(x_ref, w_ref, v_ref, o_ref):
    """Whole forward pass for one batch tile.
    x_ref:(bt,1)  w_ref:(L-1,128,128)  v_ref:(L,8,128)  o_ref:(bt,128)."""
    x = x_ref[...].astype(jnp.float32)          # (bt, 1)
    inv_h = 1.0 / float(HIDDEN)

    def ln_relu3(y, gamma, beta):
        # Padded lanes of y are exactly 0, so 128-lane sums == sums over the 50 real features.
        s1 = jnp.sum(y, axis=-1, keepdims=True)
        s2 = jnp.sum(y * y, axis=-1, keepdims=True)   # independent of s1 -> overlapping XLU reduces
        mu = s1 * inv_h
        var = s2 * inv_h - mu * mu
        yn = (y - mu) * jax.lax.rsqrt(var + LN_EPS)
        yn = yn * gamma + beta                        # padded gamma/beta == 0 -> padded lanes stay 0
        r = jnp.maximum(yn, 0.0)
        return r * r * r

    # Layer 0: input_size == 1, so the "matmul" is a pure VPU broadcast (no MXU).
    v0 = v_ref[0]                                     # (8, PAD)
    y = x * v0[3:4, :] + v0[0:1, :]                   # (bt,1)*(1,PAD) + (1,PAD)
    h = ln_relu3(y, v0[1:2, :], v0[2:3, :])

    # Layers 1..3: padded 128x128 MXU matmuls (f32 accumulate).
    for li in range(1, NUM_LAYERS - 1):
        vl = v_ref[li]
        y = jnp.dot(h, w_ref[li - 1], preferred_element_type=jnp.float32) + vl[0:1, :]
        h = ln_relu3(y, vl[1:2, :], vl[2:3, :])

    # Final Linear (lane-dense padded output; real columns are [:OUTPUT]).
    vl = v_ref[NUM_LAYERS - 1]
    out = jnp.dot(h, w_ref[NUM_LAYERS - 2], preferred_element_type=jnp.float32) + vl[0:1, :]
    o_ref[...] = out.astype(o_ref.dtype)


def pack_params(params):
    """Pack flat param list [W0,b0,g0,be0, ..., W4,b4] (W stored as (in,out))
    into the two pre-padded slabs the kernel consumes."""
    w_slab = jnp.zeros((NUM_LAYERS - 1, PAD, PAD), jnp.float32)
    v_slab = jnp.zeros((NUM_LAYERS, 8, PAD), jnp.float32)
    idx = 0
    for li in range(NUM_LAYERS):
        w, b = params[idx], params[idx + 1]
        idx += 2
        fan_in, fan_out = w.shape
        if li == 0:
            # (1, HIDDEN) weight lives in the vector slab, row 3.
            v_slab = v_slab.at[0, 3, :fan_out].set(w.reshape(-1))
        else:
            w_slab = w_slab.at[li - 1, :fan_in, :fan_out].set(w)
        v_slab = v_slab.at[li, 0, :fan_out].set(b.reshape(-1))
        if li < NUM_LAYERS - 1:
            g, be = params[idx], params[idx + 1]
            idx += 2
            v_slab = v_slab.at[li, 1, :fan_out].set(g.reshape(-1))
            v_slab = v_slab.at[li, 2, :fan_out].set(be.reshape(-1))
    return w_slab, v_slab


def _round_up(n, m):
    return ((n + m - 1) // m) * m


def normal_multi_layers_forward(x, w_slab, v_slab):
    batch = x.shape[0]
    bp = _round_up(max(batch, 1), 8)      # sublane-aligned batch
    bt = min(bp, MAX_BATCH_TILE)          # rows per grid step
    bp = _round_up(bp, bt)
    if bp != batch:
        x_in = jnp.zeros((bp, INPUT), x.dtype).at[:batch].set(x)
    else:
        x_in = x
    n_tiles = bp // bt

    out = pl.pallas_call(
        _mlp_kernel,
        out_shape=jax.ShapeDtypeStruct((bp, PAD), jnp.float32),
        grid=(n_tiles,),
        in_specs=[
            pl.BlockSpec((bt, INPUT), lambda i: (i, 0)),                     # batch tile of x
            pl.BlockSpec((NUM_LAYERS - 1, PAD, PAD), lambda i: (0, 0, 0)),   # weights: resident
            pl.BlockSpec((NUM_LAYERS, 8, PAD), lambda i: (0, 0, 0)),         # bias/gamma/beta/w0
        ],
        out_specs=pl.BlockSpec((bt, PAD), lambda i: (i, 0)),
        compiler_params=pltpu.CompilerParams(
            dimension_semantics=("parallel",),
        ),
    )(x_in, w_slab, v_slab)
    return out[:batch, :OUTPUT]


def init_params(key):
    """Deterministic init mirroring PyTorch defaults. Weights stored as (in, out)."""
    dims = [INPUT] + [HIDDEN] * (NUM_LAYERS - 1) + [OUTPUT]
    params = []
    keys = jax.random.split(key, 2 * NUM_LAYERS)
    for li in range(NUM_LAYERS):
        fan_in, fan_out = dims[li], dims[li + 1]
        bound = 1.0 / (fan_in ** 0.5)
        w = jax.random.uniform(keys[2 * li], (fan_in, fan_out),
                               minval=-bound, maxval=bound, dtype=jnp.float32)
        b = jax.random.uniform(keys[2 * li + 1], (1, fan_out),
                               minval=-bound, maxval=bound, dtype=jnp.float32)
        params.append(w)
        params.append(b)
        if li < NUM_LAYERS - 1:
            params.append(jnp.ones((1, fan_out), jnp.float32))   # LayerNorm gamma
            params.append(jnp.zeros((1, fan_out), jnp.float32))  # LayerNorm beta
    return params


def _reference_forward(x, params):
    """Pure-JAX reference (matches the PyTorch module)."""
    p = list(params)
    idx = 0
    h = x
    for _ in range(NUM_LAYERS - 1):
        w, b, g, be = p[idx], p[idx + 1], p[idx + 2], p[idx + 3]
        idx += 4
        y = h @ w + b
        mu = jnp.mean(y, axis=-1, keepdims=True)
        var = jnp.mean((y - mu) ** 2, axis=-1, keepdims=True)
        yn = (y - mu) / jnp.sqrt(var + LN_EPS) * g + be
        h = jnp.maximum(yn, 0.0) ** 3
    w, b = p[idx], p[idx + 1]
    return h @ w + b


if __name__ == "__main__":
    key = jax.random.PRNGKey(0)
    pkey, xkey = jax.random.split(key)
    params = init_params(pkey)
    w_slab, v_slab = pack_params(params)

    batch = 8
    x = jax.random.normal(xkey, (batch, INPUT), dtype=jnp.float32)

    out = normal_multi_layers_forward(x, w_slab, v_slab)
    out = jax.block_until_ready(out)

    ref = _reference_forward(x, params)
    assert out.shape == (batch, OUTPUT)
    assert jnp.allclose(out, ref, atol=1e-4, rtol=1e-4), (out, ref)

    print("KERNEL_OK")
</pallas_src>

<mosaic_0001>
module attributes {stable_mosaic.version = 11 : i64} {
  func.func @_mlp_kernel(%arg0: i32, %arg1: memref<8x1xf32, #tpu.memory_space<vmem>>, %arg2: memref<4x128x128xf32, #tpu.memory_space<vmem>>, %arg3: memref<5x8x128xf32, #tpu.memory_space<vmem>>, %arg4: memref<8x128xf32, #tpu.memory_space<vmem>>) attributes {dimension_semantics = [#tpu.dimension_semantics<parallel>], iteration_bounds = array<i64: 1>, scalar_prefetch = 0 : i64, scratch_operands = 0 : i64, tpu.core_type = #tpu.core_type<tc>, window_params = [{transform_indices = @transform_0, window_bounds = array<i64: 8, 1>}, {pipeline_mode = #tpu.pipeline_mode<synchronous>, transform_indices = @transform_1, window_bounds = array<i64: 4, 128, 128>}, {pipeline_mode = #tpu.pipeline_mode<synchronous>, transform_indices = @transform_2, window_bounds = array<i64: 5, 8, 128>}, {transform_indices = @transform_3, window_bounds = array<i64: 8, 128>}]} {
    %c0 = arith.constant 0 : index
    %c0_0 = arith.constant 0 : index
    %0 = vector.load %arg1[%c0, %c0_0] : memref<8x1xf32, #tpu.memory_space<vmem>>, vector<8x1xf32>
    %c0_1 = arith.constant 0 : index
    %c0_2 = arith.constant 0 : index
    %c0_3 = arith.constant 0 : index
    %1 = vector.load %arg3[%c0_1, %c0_2, %c0_3] : memref<5x8x128xf32, #tpu.memory_space<vmem>>, vector<1x8x128xf32>
    %2 = vector.shape_cast %1 : vector<1x8x128xf32> to vector<8x128xf32>
    %3 = vector.extract_strided_slice %2 {offsets = [3, 0], sizes = [1, 128], strides = [1, 1]} : vector<8x128xf32> to vector<1x128xf32>
    %4 = vector.broadcast %0 : vector<8x1xf32> to vector<8x128xf32>
    %5 = vector.broadcast %3 : vector<1x128xf32> to vector<8x128xf32>
    %6 = arith.mulf %4, %5 : vector<8x128xf32>
    %7 = vector.extract_strided_slice %2 {offsets = [0, 0], sizes = [1, 128], strides = [1, 1]} : vector<8x128xf32> to vector<1x128xf32>
    %8 = vector.broadcast %7 : vector<1x128xf32> to vector<8x128xf32>
    %9 = arith.addf %6, %8 : vector<8x128xf32>
    %10 = vector.extract_strided_slice %2 {offsets = [1, 0], sizes = [1, 128], strides = [1, 1]} : vector<8x128xf32> to vector<1x128xf32>
    %11 = vector.extract_strided_slice %2 {offsets = [2, 0], sizes = [1, 128], strides = [1, 1]} : vector<8x128xf32> to vector<1x128xf32>
    %cst = arith.constant dense<0.000000e+00> : vector<8xf32>
    %12 = vector.multi_reduction <add>, %9, %cst [1] : vector<8x128xf32> to vector<8xf32>
    %13 = vector.shape_cast %12 : vector<8xf32> to vector<8x1xf32>
    %14 = arith.mulf %9, %9 : vector<8x128xf32>
    %cst_4 = arith.constant dense<0.000000e+00> : vector<8xf32>
    %15 = vector.multi_reduction <add>, %14, %cst_4 [1] : vector<8x128xf32> to vector<8xf32>
    %16 = vector.shape_cast %15 : vector<8xf32> to vector<8x1xf32>
    %cst_5 = arith.constant 2.000000e-02 : f32
    %17 = vector.broadcast %cst_5 : f32 to vector<8x1xf32>
    %18 = arith.mulf %13, %17 : vector<8x1xf32>
    %cst_6 = arith.constant 2.000000e-02 : f32
    %19 = vector.broadcast %cst_6 : f32 to vector<8x1xf32>
    %20 = arith.mulf %16, %19 : vector<8x1xf32>
    %21 = arith.mulf %18, %18 : vector<8x1xf32>
    %22 = arith.subf %20, %21 : vector<8x1xf32>
    %23 = vector.broadcast %18 : vector<8x1xf32> to vector<8x128xf32>
    %24 = arith.subf %9, %23 : vector<8x128xf32>
    %cst_7 = arith.constant 9.99999974E-6 : f32
    %25 = vector.broadcast %cst_7 : f32 to vector<8x1xf32>
    %26 = arith.addf %22, %25 : vector<8x1xf32>
    %27 = math.rsqrt %26 : vector<8x1xf32>
    %28 = vector.broadcast %27 : vector<8x1xf32> to vector<8x128xf32>
    %29 = arith.mulf %24, %28 : vector<8x128xf32>
    %30 = vector.broadcast %10 : vector<1x128xf32> to vector<8x128xf32>
    %31 = arith.mulf %29, %30 : vector<8x128xf32>
    %32 = vector.broadcast %11 : vector<1x128xf32> to vector<8x128xf32>
    %33 = arith.addf %31, %32 : vector<8x128xf32>
    %cst_8 = arith.constant 0.000000e+00 : f32
    %34 = vector.broadcast %cst_8 : f32 to vector<8x128xf32>
    %35 = arith.maximumf %33, %34 : vector<8x128xf32>
    %36 = arith.mulf %35, %35 : vector<8x128xf32>
    %37 = arith.mulf %36, %35 : vector<8x128xf32>
    %c1 = arith.constant 1 : index
    %c0_9 = arith.constant 0 : index
    %c0_10 = arith.constant 0 : index
    %38 = vector.load %arg3[%c1, %c0_9, %c0_10] : memref<5x8x128xf32, #tpu.memory_space<vmem>>, vector<1x8x128xf32>
    %39 = vector.shape_cast %38 : vector<1x8x128xf32> to vector<8x128xf32>
    %c0_11 = arith.constant 0 : index
    %c0_12 = arith.constant 0 : index
    %c0_13 = arith.constant 0 : index
    %40 = vector.load %arg2[%c0_11, %c0_12, %c0_13] : memref<4x128x128xf32, #tpu.memory_space<vmem>>, vector<1x128x128xf32>
    %41 = vector.shape_cast %40 : vector<1x128x128xf32> to vector<128x128xf32>
    %cst_14 = arith.constant dense<0.000000e+00> : vector<8x128xf32>
    %42 = tpu.matmul %37, %41, %cst_14 {dimension_numbers = #tpu.dot_dimension_numbers<[1], [0], [0], [1], [0, 0, 1, 1], [], []>} : vector<8x128xf32>, vector<128x128xf32>, vector<8x128xf32> -> vector<8x128xf32>
    %43 = vector.extract_strided_slice %39 {offsets = [0, 0], sizes = [1, 128], strides = [1, 1]} : vector<8x128xf32> to vector<1x128xf32>
    %44 = vector.broadcast %43 : vector<1x128xf32> to vector<8x128xf32>
    %45 = arith.addf %42, %44 : vector<8x128xf32>
    %46 = vector.extract_strided_slice %39 {offsets = [1, 0], sizes = [1, 128], strides = [1, 1]} : vector<8x128xf32> to vector<1x128xf32>
    %47 = vector.extract_strided_slice %39 {offsets = [2, 0], sizes = [1, 128], strides = [1, 1]} : vector<8x128xf32> to vector<1x128xf32>
    %cst_15 = arith.constant dense<0.000000e+00> : vector<8xf32>
    %48 = vector.multi_reduction <add>, %45, %cst_15 [1] : vector<8x128xf32> to vector<8xf32>
    %49 = vector.shape_cast %48 : vector<8xf32> to vector<8x1xf32>
    %50 = arith.mulf %45, %45 : vector<8x128xf32>
    %cst_16 = arith.constant dense<0.000000e+00> : vector<8xf32>
    %51 = vector.multi_reduction <add>, %50, %cst_16 [1] : vector<8x128xf32> to vector<8xf32>
    %52 = vector.shape_cast %51 : vector<8xf32> to vector<8x1xf32>
    %cst_17 = arith.constant 2.000000e-02 : f32
    %53 = vector.broadcast %cst_17 : f32 to vector<8x1xf32>
    %54 = arith.mulf %49, %53 : vector<8x1xf32>
    %cst_18 = arith.constant 2.000000e-02 : f32
    %55 = vector.broadcast %cst_18 : f32 to vector<8x1xf32>
    %56 = arith.mulf %52, %55 : vector<8x1xf32>
    %57 = arith.mulf %54, %54 : vector<8x1xf32>
    %58 = arith.subf %56, %57 : vector<8x1xf32>
    %59 = vector.broadcast %54 : vector<8x1xf32> to vector<8x128xf32>
    %60 = arith.subf %45, %59 : vector<8x128xf32>
    %cst_19 = arith.constant 9.99999974E-6 : f32
    %61 = vector.broadcast %cst_19 : f32 to vector<8x1xf32>
    %62 = arith.addf %58, %61 : vector<8x1xf32>
    %63 = math.rsqrt %62 : vector<8x1xf32>
    %64 = vector.broadcast %63 : vector<8x1xf32> to vector<8x128xf32>
    %65 = arith.mulf %60, %64 : vector<8x128xf32>
    %66 = vector.broadcast %46 : vector<1x128xf32> to vector<8x128xf32>
    %67 = arith.mulf %65, %66 : vector<8x128xf32>
    %68 = vector.broadcast %47 : vector<1x128xf32> to vector<8x128xf32>
    %69 = arith.addf %67, %68 : vector<8x128xf32>
    %cst_20 = arith.constant 0.000000e+00 : f32
    %70 = vector.broadcast %cst_20 : f32 to vector<8x128xf32>
    %71 = arith.maximumf %69, %70 : vector<8x128xf32>
    %72 = arith.mulf %71, %71 : vector<8x128xf32>
    %73 = arith.mulf %72, %71 : vector<8x128xf32>
    %c2 = arith.constant 2 : index
    %c0_21 = arith.constant 0 : index
    %c0_22 = arith.constant 0 : index
    %74 = vector.load %arg3[%c2, %c0_21, %c0_22] : memref<5x8x128xf32, #tpu.memory_space<vmem>>, vector<1x8x128xf32>
    %75 = vector.shape_cast %74 : vector<1x8x128xf32> to vector<8x128xf32>
    %c1_23 = arith.constant 1 : index
    %c0_24 = arith.constant 0 : index
    %c0_25 = arith.constant 0 : index
    %76 = vector.load %arg2[%c1_23, %c0_24, %c0_25] : memref<4x128x128xf32, #tpu.memory_space<vmem>>, vector<1x128x128xf32>
    %77 = vector.shape_cast %76 : vector<1x128x128xf32> to vector<128x128xf32>
    %cst_26 = arith.constant dense<0.000000e+00> : vector<8x128xf32>
    %78 = tpu.matmul %73, %77, %cst_26 {dimension_numbers = #tpu.dot_dimension_numbers<[1], [0], [0], [1], [0, 0, 1, 1], [], []>} : vector<8x128xf32>, vector<128x128xf32>, vector<8x128xf32> -> vector<8x128xf32>
    %79 = vector.extract_strided_slice %75 {offsets = [0, 0], sizes = [1, 128], strides = [1, 1]} : vector<8x128xf32> to vector<1x128xf32>
    %80 = vector.broadcast %79 : vector<1x128xf32> to vector<8x128xf32>
    %81 = arith.addf %78, %80 : vector<8x128xf32>
    %82 = vector.extract_strided_slice %75 {offsets = [1, 0], sizes = [1, 128], strides = [1, 1]} : vector<8x128xf32> to vector<1x128xf32>
    %83 = vector.extract_strided_slice %75 {offsets = [2, 0], sizes = [1, 128], strides = [1, 1]} : vector<8x128xf32> to vector<1x128xf32>
    %cst_27 = arith.constant dense<0.000000e+00> : vector<8xf32>
    %84 = vector.multi_reduction <add>, %81, %cst_27 [1] : vector<8x128xf32> to vector<8xf32>
    %85 = vector.shape_cast %84 : vector<8xf32> to vector<8x1xf32>
    %86 = arith.mulf %81, %81 : vector<8x128xf32>
    %cst_28 = arith.constant dense<0.000000e+00> : vector<8xf32>
    %87 = vector.multi_reduction <add>, %86, %cst_28 [1] : vector<8x128xf32> to vector<8xf32>
    %88 = vector.shape_cast %87 : vector<8xf32> to vector<8x1xf32>
    %cst_29 = arith.constant 2.000000e-02 : f32
    %89 = vector.broadcast %cst_29 : f32 to vector<8x1xf32>
    %90 = arith.mulf %85, %89 : vector<8x1xf32>
    %cst_30 = arith.constant 2.000000e-02 : f32
    %91 = vector.broadcast %cst_30 : f32 to vector<8x1xf32>
    %92 = arith.mulf %88, %91 : vector<8x1xf32>
    %93 = arith.mulf %90, %90 : vector<8x1xf32>
    %94 = arith.subf %92, %93 : vector<8x1xf32>
    %95 = vector.broadcast %90 : vector<8x1xf32> to vector<8x128xf32>
    %96 = arith.subf %81, %95 : vector<8x128xf32>
    %cst_31 = arith.constant 9.99999974E-6 : f32
    %97 = vector.broadcast %cst_31 : f32 to vector<8x1xf32>
    %98 = arith.addf %94, %97 : vector<8x1xf32>
    %99 = math.rsqrt %98 : vector<8x1xf32>
    %100 = vector.broadcast %99 : vector<8x1xf32> to vector<8x128xf32>
    %101 = arith.mulf %96, %100 : vector<8x128xf32>
    %102 = vector.broadcast %82 : vector<1x128xf32> to vector<8x128xf32>
    %103 = arith.mulf %101, %102 : vector<8x128xf32>
    %104 = vector.broadcast %83 : vector<1x128xf32> to vector<8x128xf32>
    %105 = arith.addf %103, %104 : vector<8x128xf32>
    %cst_32 = arith.constant 0.000000e+00 : f32
    %106 = vector.broadcast %cst_32 : f32 to vector<8x128xf32>
    %107 = arith.maximumf %105, %106 : vector<8x128xf32>
    %108 = arith.mulf %107, %107 : vector<8x128xf32>
    %109 = arith.mulf %108, %107 : vector<8x128xf32>
    %c3 = arith.constant 3 : index
    %c0_33 = arith.constant 0 : index
    %c0_34 = arith.constant 0 : index
    %110 = vector.load %arg3[%c3, %c0_33, %c0_34] : memref<5x8x128xf32, #tpu.memory_space<vmem>>, vector<1x8x128xf32>
    %111 = vector.shape_cast %110 : vector<1x8x128xf32> to vector<8x128xf32>
    %c2_35 = arith.constant 2 : index
    %c0_36 = arith.constant 0 : index
    %c0_37 = arith.constant 0 : index
    %112 = vector.load %arg2[%c2_35, %c0_36, %c0_37] : memref<4x128x128xf32, #tpu.memory_space<vmem>>, vector<1x128x128xf32>
    %113 = vector.shape_cast %112 : vector<1x128x128xf32> to vector<128x128xf32>
    %cst_38 = arith.constant dense<0.000000e+00> : vector<8x128xf32>
    %114 = tpu.matmul %109, %113, %cst_38 {dimension_numbers = #tpu.dot_dimension_numbers<[1], [0], [0], [1], [0, 0, 1, 1], [], []>} : vector<8x128xf32>, vector<128x128xf32>, vector<8x128xf32> -> vector<8x128xf32>
    %115 = vector.extract_strided_slice %111 {offsets = [0, 0], sizes = [1, 128], strides = [1, 1]} : vector<8x128xf32> to vector<1x128xf32>
    %116 = vector.broadcast %115 : vector<1x128xf32> to vector<8x128xf32>
    %117 = arith.addf %114, %116 : vector<8x128xf32>
    %118 = vector.extract_strided_slice %111 {offsets = [1, 0], sizes = [1, 128], strides = [1, 1]} : vector<8x128xf32> to vector<1x128xf32>
    %119 = vector.extract_strided_slice %111 {offsets = [2, 0], sizes = [1, 128], strides = [1, 1]} : vector<8x128xf32> to vector<1x128xf32>
    %cst_39 = arith.constant dense<0.000000e+00> : vector<8xf32>
    %120 = vector.multi_reduction <add>, %117, %cst_39 [1] : vector<8x128xf32> to vector<8xf32>
    %121 = vector.shape_cast %120 : vector<8xf32> to vector<8x1xf32>
    %122 = arith.mulf %117, %117 : vector<8x128xf32>
    %cst_40 = arith.constant dense<0.000000e+00> : vector<8xf32>
    %123 = vector.multi_reduction <add>, %122, %cst_40 [1] : vector<8x128xf32> to vector<8xf32>
    %124 = vector.shape_cast %123 : vector<8xf32> to vector<8x1xf32>
    %cst_41 = arith.constant 2.000000e-02 : f32
    %125 = vector.broadcast %cst_41 : f32 to vector<8x1xf32>
    %126 = arith.mulf %121, %125 : vector<8x1xf32>
    %cst_42 = arith.constant 2.000000e-02 : f32
    %127 = vector.broadcast %cst_42 : f32 to vector<8x1xf32>
    %128 = arith.mulf %124, %127 : vector<8x1xf32>
    %129 = arith.mulf %126, %126 : vector<8x1xf32>
    %130 = arith.subf %128, %129 : vector<8x1xf32>
    %131 = vector.broadcast %126 : vector<8x1xf32> to vector<8x128xf32>
    %132 = arith.subf %117, %131 : vector<8x128xf32>
    %cst_43 = arith.constant 9.99999974E-6 : f32
    %133 = vector.broadcast %cst_43 : f32 to vector<8x1xf32>
    %134 = arith.addf %130, %133 : vector<8x1xf32>
    %135 = math.rsqrt %134 : vector<8x1xf32>
    %136 = vector.broadcast %135 : vector<8x1xf32> to vector<8x128xf32>
    %137 = arith.mulf %132, %136 : vector<8x128xf32>
    %138 = vector.broadcast %118 : vector<1x128xf32> to vector<8x128xf32>
    %139 = arith.mulf %137, %138 : vector<8x128xf32>
    %140 = vector.broadcast %119 : vector<1x128xf32> to vector<8x128xf32>
    %141 = arith.addf %139, %140 : vector<8x128xf32>
    %cst_44 = arith.constant 0.000000e+00 : f32
    %142 = vector.broadcast %cst_44 : f32 to vector<8x128xf32>
    %143 = arith.maximumf %141, %142 : vector<8x128xf32>
    %144 = arith.mulf %143, %143 : vector<8x128xf32>
    %145 = arith.mulf %144, %143 : vector<8x128xf32>
    %c4 = arith.constant 4 : index
    %c0_45 = arith.constant 0 : index
    %c0_46 = arith.constant 0 : index
    %146 = vector.load %arg3[%c4, %c0_45, %c0_46] : memref<5x8x128xf32, #tpu.memory_space<vmem>>, vector<1x8x128xf32>
    %147 = vector.shape_cast %146 : vector<1x8x128xf32> to vector<8x128xf32>
    %c3_47 = arith.constant 3 : index
    %c0_48 = arith.constant 0 : index
    %c0_49 = arith.constant 0 : index
    %148 = vector.load %arg2[%c3_47, %c0_48, %c0_49] : memref<4x128x128xf32, #tpu.memory_space<vmem>>, vector<1x128x128xf32>
    %149 = vector.shape_cast %148 : vector<1x128x128xf32> to vector<128x128xf32>
    %cst_50 = arith.constant dense<0.000000e+00> : vector<8x128xf32>
    %150 = tpu.matmul %145, %149, %cst_50 {dimension_numbers = #tpu.dot_dimension_numbers<[1], [0], [0], [1], [0, 0, 1, 1], [], []>} : vector<8x128xf32>, vector<128x128xf32>, vector<8x128xf32> -> vector<8x128xf32>
    %151 = vector.extract_strided_slice %147 {offsets = [0, 0], sizes = [1, 128], strides = [1, 1]} : vector<8x128xf32> to vector<1x128xf32>
    %152 = vector.broadcast %151 : vector<1x128xf32> to vector<8x128xf32>
    %153 = arith.addf %150, %152 : vector<8x128xf32>
    %c0_51 = arith.constant 0 : index
    %c0_52 = arith.constant 0 : index
    %154 = vector.load %arg4[%c0_51, %c0_52] : memref<8x128xf32, #tpu.memory_space<vmem>>, vector<8x128xf32>
    tpu.vector_store %arg4[%c0_51, %c0_52], %153 {strides = array<i32>} : memref<8x128xf32, #tpu.memory_space<vmem>>, vector<8x128xf32>,
    return
  }
  func.func @transform_0(%arg0: i32) -> (i32, i32) {
    %c0_i32 = arith.constant 0 : i32
    %c0_i32_0 = arith.constant 0 : i32
    return %arg0, %c0_i32 : i32, i32
  }
  func.func @transform_1(%arg0: i32) -> (i32, i32, i32) {
    %c0_i32 = arith.constant 0 : i32
    %c0_i32_0 = arith.constant 0 : i32
    %c0_i32_1 = arith.constant 0 : i32
    %c0_i32_2 = arith.constant 0 : i32
    return %c0_i32, %c0_i32_0, %c0_i32_1 : i32, i32, i32
  }
  func.func @transform_2(%arg0: i32) -> (i32, i32, i32) {
    %c0_i32 = arith.constant 0 : i32
    %c0_i32_0 = arith.constant 0 : i32
    %c0_i32_1 = arith.constant 0 : i32
    %c0_i32_2 = arith.constant 0 : i32
    return %c0_i32, %c0_i32_0, %c0_i32_1 : i32, i32, i32
  }
  func.func @transform_3(%arg0: i32) -> (i32, i32) {
    %c0_i32 = arith.constant 0 : i32
    %c0_i32_0 = arith.constant 0 : i32
    return %arg0, %c0_i32 : i32, i32
  }
}

</mosaic_0001>

<bundles_post_ra>
// kernel: tpu_custom_call.1
= control target key start
LH: loop header
LB: loop body
LE: loop exit
PB: predicated region body
PF: predicated region fallthrough
CT: control target
= control target key end

     0   :  { %8 = vsyncpa [#allocation3], 0  ;;  %s1025_s0 = inlined_call_operand.vmem [shape: f32[8,1], index: 0, kind: input, shape index: {}]   ;;  %s1026_s1 = inlined_call_operand.hbm [shape: f32[4,128,128], index: 1, kind: input, shape index: {}]   ;;  %s1027_s2 = inlined_call_operand.hbm [shape: f32[5,8,128], index: 2, kind: input, shape index: {}]   ;;  %s1028_s3 = inlined_call_operand.hbm [shape: f32[8,128], index: 3, kind: output, shape index: {}]  }
   0x1   :  { %9 = vsyncpa [#allocation6], 0 }
   0x2   :  { %10 = vsyncpa [#allocation4], 0  ;;  %s843_s12 = smov [#allocation2]  }
   0x3   :  { %s18_s13 = sshll.u32 %s843_s12, 4  ;;  %s19_s13 = int_to_ptr.vmem [resolvable:$true] %s18_s13 }
   0x4   :  { %s785_s14 = scalar_lea.vmem %s19_s13, 8192  ;;  %p790_p1 = scmp.lt.s32.totalorder %s19_s13, %s19_s13 }
   0x5   :  { %p786_p0 = scmp.ne.s32.totalorder %s19_s13, %s785_s14  ;;  %p791_p2 = scmp.lt.s32.totalorder %s785_s14, %s785_s14 }
   0x7   :  { %p792_p3 = por %p791_p2, %p790_p1 }
   0x9   :  { %p793_p4 = pnand %p792_p3, %p786_p0 }
   0xb   :  { %796 = shalt.err (!%p793_p4)
}
   0xc   :  { %s844_s15 = smov 128   ;;  %s845_s16 = smov 8  }
   0xd   :  { %24 = dma.hbm_to_vmem [thread:$0]  %s1026_s1, 8192, %s19_s13, [#allocation3], %s844_s15, %s844_s15, %s845_s16  }
   0xe   :  { %s846_s19 = smov [#allocation5]  }
   0xf   :  { %s30_s20 = sshll.u32 %s846_s19, 4  ;;  %s31_s20 = int_to_ptr.vmem [resolvable:$true] %s30_s20 }
  0x10   :  { %s805_s21 = scalar_lea.vmem %s31_s20, 640  ;;  %p810_p6 = scmp.lt.s32.totalorder %s31_s20, %s31_s20 }
  0x11   :  { %p806_p5 = scmp.ne.s32.totalorder %s31_s20, %s805_s21  ;;  %p811_p7 = scmp.lt.s32.totalorder %s805_s21, %s805_s21 }
  0x13   :  { %p812_p8 = por %p811_p7, %p810_p6 }
  0x15   :  { %p813_p9 = pnand %p812_p8, %p806_p5 }
  0x17   :  { %816 = shalt.err (!%p813_p9)
}
  0x18   :  { %36 = dma.hbm_to_vmem [thread:$0]  %s1027_s2, 640, %s31_s20, [#allocation6], %s844_s15, %s844_s15, %s845_s16  }
  0x19   :  { %837 = dma.done.wait [#allocation3], 8192  }
  0x1a   :  { %838 = vsyncadd [#allocation3], 4294959104 }
  0x1b   :  { %839 = dma.done.wait [#allocation6], 640  }
  0x1c   :  { %840 = vsyncadd [#allocation6], 4294966656  ;;  %v847_v0 = vmov 0   ;;  %v43_v1 = vld [vmem:[%s1025_s0] sm:$0xff]  ;;  %v50_v2 = vlaneseq  ;;  %v848_v13 = vmov 0.0   ;;  %v103_v14 = vld [vmem:[#allocation2 + $0x78] sm:$0xff] }
  0x1d   :  { %768 = vset.pattern.permute.xlu0 %v847_v0  ;;  %v883_v5 = vld [vmem:[#allocation5] sm:$0xff]  ;;  %620 = vmatprep.subr.mxu0 %v848_v13  ;;  %v102_v15 = vld [vmem:[#allocation2 + $0x70] sm:$0xff]  ;;  %v101_v16 = vld [vmem:[#allocation2 + $0x68] sm:$0xff]  ;;  %vm849_vm0 = vmmov 0   ;;  %s850_s0 = smov [#allocation7]  }
  0x1e   :  { %47 = vperm.xlu0 %768, %v43_v1   ;;  %v880_v3 = vshrl.u32 %v50_v2, 7  ;;  %655 = vmatprep.subr.mxu1 %v848_v13  ;;  %v100_v17 = vld [vmem:[#allocation2 + $0x60] sm:$0xff]  ;;  %v99_v18 = vld [vmem:[#allocation2 + $0x58] sm:$0xff]  ;;  %v98_v19 = vld [vmem:[#allocation2 + $0x50] sm:$0xff]  ;;  %s542_s2 = sshll.u32 %s850_s0, 4  ;;  %s543_s2 = int_to_ptr.vmem [resolvable:$true] %s542_s2 }
  0x1f   :  { %621 = vmatpush3.msra.mxu0 %v103_v14  ;;  %652 = vmatprep.mubr.msk.f32.mxu0 %vm849_vm0, %v848_v13  ;;  %v97_v20 = vld [vmem:[#allocation2 + $0x48] sm:$0xff]  ;;  %v96_v21 = vld [vmem:[#allocation2 + $0x40] sm:$0xff]  ;;  %v95_v22 = vld [vmem:[#allocation2 + $0x38] sm:$0xff]  ;;  %s817_s25 = scalar_lea.vmem %s543_s2, 128  ;;  %p822_p11 = scmp.lt.s32.totalorder %s543_s2, %s543_s2 }
  0x20   :  { %v52_v4 = vsub.s32 3, %v880_v3  ;;  %v886_v6 = vsub.s32 0, %v880_v3  ;;  %622 = vmatprep.subr.mxu0 %v848_v13  ;;  %687 = vmatprep.mubr.msk.f32.mxu1 %vm849_vm0, %v848_v13  ;;  %v94_v23 = vld [vmem:[#allocation2 + $0x30] sm:$0xff]  ;;  %v93_v24 = vld [vmem:[#allocation2 + $0x28] sm:$0xff]  ;;  %v92_v25 = vld [vmem:[#allocation2 + $0x20] sm:$0xff]  ;;  %v919_v37 = vsub.s32 1, %v880_v3  ;;  %p818_p10 = scmp.ne.s32.totalorder %s543_s2, %s817_s25  ;;  %p823_p12 = scmp.lt.s32.totalorder %s817_s25, %s817_s25 }
  0x21   :  { %623 = vmatpush3.msra.mxu0 %v102_v15  ;;  %v91_v26 = vld [vmem:[#allocation2 + $0x18] sm:$0xff]  ;;  %v90_v27 = vld [vmem:[#allocation2 + $0x10] sm:$0xff]  ;;  %v89_v28 = vld [vmem:[#allocation2 + $0x8] sm:$0xff]  ;;  %v922_v38 = vsub.s32 2, %v880_v3 }
  0x22   :  { %v53_v7 = vrot.slane %v883_v5, %v52_v4  ;;  %v58_v8 = vrot.slane %v883_v5, %v886_v6  ;;  %624 = vmatprep.subr.mxu0 %v848_v13  ;;  %v88_v29 = vld [vmem:[#allocation2] sm:$0xff]  ;;  %v76_v40 = vrot.slane %v883_v5, %v919_v37  ;;  %v931_v49 = vld [vmem:[#allocation5 + $0x8] sm:$0xff]  ;;  %v222_v55 = vld [vmem:[#allocation2 + $0xf8] sm:$0xff]  ;;  %p824_p13 = por %p823_p12, %p822_p11 }
  0x23   :  { %625 = vmatpush3.msra.mxu0 %v101_v16  ;;  %v81_v43 = vrot.slane %v883_v5, %v922_v38  ;;  %v107_v50 = vrot.slane %v931_v49, %v886_v6  ;;  %656 = vmatpush3.msra.mxu1 %v222_v55  ;;  %v221_v56 = vld [vmem:[#allocation2 + $0xf0] sm:$0xff]  ;;  %v220_v57 = vld [vmem:[#allocation2 + $0xe8] sm:$0xff]  ;;  %v219_v58 = vld [vmem:[#allocation2 + $0xe0] sm:$0xff]  ;;  %v194_v16 = vrot.slane %v931_v49, %v919_v37 }
  0x24   :  { %626 = vmatprep.subr.mxu0 %v848_v13  ;;  %657 = vmatprep.subr.mxu1 %v848_v13  ;;  %v218_v59 = vld [vmem:[#allocation2 + $0xd8] sm:$0xff]  ;;  %v217_v60 = vld [vmem:[#allocation2 + $0xd0] sm:$0xff]  ;;  %v216_v61 = vld [vmem:[#allocation2 + $0xc8] sm:$0xff]  ;;  %p825_p0 = pnand %p824_p13, %p818_p10 }
  0x25   :  { %627 = vmatpush3.msra.mxu0 %v100_v17  ;;  %658 = vmatpush3.msra.mxu1 %v221_v56  ;;  %v215_v62 = vld [vmem:[#allocation2 + $0xc0] sm:$0xff]  ;;  %v214_v63 = vld [vmem:[#allocation2 + $0xb8] sm:$0xff]  ;;  %v213_v0 = vld [vmem:[#allocation2 + $0xb0] sm:$0xff] }
  0x26   :  { %628 = vmatprep.subr.mxu0 %v848_v13  ;;  %659 = vmatprep.subr.mxu1 %v848_v13  ;;  %v212_v1 = vld [vmem:[#allocation2 + $0xa8] sm:$0xff]  ;;  %v211_v2 = vld [vmem:[#allocation2 + $0xa0] sm:$0xff]  ;;  %v210_v3 = vld [vmem:[#allocation2 + $0x98] sm:$0xff] }
  0x27   :  { %629 = vmatpush3.msra.mxu0 %v99_v18  ;;  %660 = vmatpush3.msra.mxu1 %v220_v57  ;;  %v209_v4 = vld [vmem:[#allocation2 + $0x90] sm:$0xff]  ;;  %v208_v5 = vld [vmem:[#allocation2 + $0x88] sm:$0xff] }
  0x28   :  { %630 = vmatprep.subr.mxu0 %v848_v13  ;;  %661 = vmatprep.subr.mxu1 %v848_v13 }
  0x29   :  { %631 = vmatpush3.msra.mxu0 %v98_v19  ;;  %662 = vmatpush3.msra.mxu1 %v219_v58  ;;  %v199_v19 = vrot.slane %v931_v49, %v922_v38  ;;  %v326_v49 = vld [vmem:[#allocation2 + $0x100] sm:$0xff] }
  0x2a   :  { %632 = vmatprep.subr.mxu0 %v848_v13  ;;  %663 = vmatprep.subr.mxu1 %v848_v13 }
  0x2b   :  { %633 = vmatpush3.msra.mxu0 %v97_v20  ;;  %664 = vmatpush3.msra.mxu1 %v218_v59 }
  0x2c   :  { %634 = vmatprep.subr.mxu0 %v848_v13  ;;  %665 = vmatprep.subr.mxu1 %v848_v13 }
  0x2d   :  { %635 = vmatpush3.msra.mxu0 %v96_v21  ;;  %666 = vmatpush3.msra.mxu1 %v217_v60 }
  0x2e   :  { %636 = vmatprep.subr.mxu0 %v848_v13  ;;  %667 = vmatprep.subr.mxu1 %v848_v13 }
  0x2f   :  { %637 = vmatpush3.msra.mxu0 %v95_v22  ;;  %668 = vmatpush3.msra.mxu1 %v216_v61 }
  0x30   :  { %638 = vmatprep.subr.mxu0 %v848_v13  ;;  %669 = vmatprep.subr.mxu1 %v848_v13 }
  0x31   :  { %639 = vmatpush3.msra.mxu0 %v94_v23  ;;  %670 = vmatpush3.msra.mxu1 %v215_v62 }
  0x32   :  { %640 = vmatprep.subr.mxu0 %v848_v13  ;;  %671 = vmatprep.subr.mxu1 %v848_v13 }
  0x33   :  { %641 = vmatpush3.msra.mxu0 %v93_v24  ;;  %672 = vmatpush3.msra.mxu1 %v214_v63 }
  0x34   :  { %642 = vmatprep.subr.mxu0 %v848_v13  ;;  %673 = vmatprep.subr.mxu1 %v848_v13 }
  0x35   :  { %643 = vmatpush3.msra.mxu0 %v92_v25  ;;  %674 = vmatpush3.msra.mxu1 %v213_v0 }
  0x36   :  { %644 = vmatprep.subr.mxu0 %v848_v13  ;;  %675 = vmatprep.subr.mxu1 %v848_v13 }
  0x37   :  { %645 = vmatpush3.msra.mxu0 %v91_v26  ;;  %676 = vmatpush3.msra.mxu1 %v212_v1  ;;  %v963_v26 = vld [vmem:[#allocation5 + $0x10] sm:$0xff] }
  0x38   :  { %646 = vmatprep.subr.mxu0 %v848_v13  ;;  %677 = vmatprep.subr.mxu1 %v848_v13  ;;  %v313_v57 = vrot.slane %v963_v26, %v919_v37  ;;  %v318_v60 = vrot.slane %v963_v26, %v922_v38 }
  0x39   :  { %647 = vmatpush3.msra.mxu0 %v90_v27  ;;  %678 = vmatpush3.msra.mxu1 %v211_v2  ;;  %v226_v27 = vrot.slane %v963_v26, %v886_v6  ;;  %v445_v26 = vld [vmem:[#allocation2 + $0x180] sm:$0xff] }
  0x3a   :  { %648 = vmatprep.subr.mxu0 %v848_v13  ;;  %679 = vmatprep.subr.mxu1 %v848_v13 }
  0x3b   :  { %649 = vmatpush3.msra.mxu0 %v89_v28  ;;  %680 = vmatpush3.msra.mxu1 %v210_v3  ;;  %v992_v3 = vld [vmem:[#allocation5 + $0x18] sm:$0xff] }
  0x3c   :  { %650 = vmatprep.subr.mxu0 %v848_v13  ;;  %681 = vmatprep.subr.mxu1 %v848_v13 }
  0x3d   :  { %651 = vmatpush3.msra.mxu0 %v88_v29  ;;  %682 = vmatpush3.msra.mxu1 %v209_v4  ;;  %v345_v4 = vrot.slane %v992_v3, %v886_v6 }
  0x3e   :  { %690 = vmatprep.subr.mxu0 %v848_v13  ;;  %683 = vmatprep.subr.mxu1 %v848_v13 }
  0x3f   :  { %684 = vmatpush3.msra.mxu1 %v208_v5 }
  0x40   :  { %685 = vmatprep.subr.mxu1 %v848_v13 }
  0x99   :  { %v48_v9 = vpop.permute.xlu0 %47 }
  0x9a   :  { %v54_v10 = vmul.f32 %v53_v7, %v48_v9  ;;  %v207_v7 = vld [vmem:[#allocation2 + $0x80] sm:$0xff] }
  0x9b   :  { %686 = vmatpush3.msra.mxu1 %v207_v7 }
  0x9c   :  { %v891_v11 = vadd.f32 %v58_v8, %v54_v10  ;;  %725 = vmatprep.subr.mxu1 %v848_v13 }
  0x9e   :  { %60 = vadd.xlane.f32.xlu0 %v891_v11  ;;  %v62_v12 = vmul.f32 %v891_v11, %v891_v11 }
  0xa0   :  { %63 = vadd.xlane.f32.xlu1 %v62_v12 }
 0x127   :  { %v61_v30 = vpop.xlane.xlu0 %60 }
 0x128   :  { %v65_v31 = vmul.f32 0.02, %v61_v30 }
 0x129   :  { %v64_v32 = vpop.xlane.xlu1 %63 }
 0x12a   :  { %v67_v33 = vmul.f32 %v65_v31, %v65_v31  ;;  %v66_v34 = vmul.f32 0.02, %v64_v32  ;;  %v69_v39 = vsub.f32 %v891_v11, %v65_v31  ;;  %v341_v32 = vld [vmem:[#allocation2 + $0x178] sm:$0xff] }
 0x12c   :  { %v68_v35 = vsub.f32 %v66_v34, %v67_v33  ;;  %v340_v33 = vld [vmem:[#allocation2 + $0x170] sm:$0xff]  ;;  %v339_v34 = vld [vmem:[#allocation2 + $0x168] sm:$0xff] }
 0x12e   :  { %v70_v36 = vadd.f32 1e-05, %v68_v35  ;;  %v338_v35 = vld [vmem:[#allocation2 + $0x160] sm:$0xff] }
 0x130   :  { %769 = vrsqrt.f32 %v70_v36  ;;  %v337_v36 = vld [vmem:[#allocation2 + $0x158] sm:$0xff] }
 0x13d   :  { %v770_v41 = vpop.eup %769 }
 0x13e   :  { %v72_v42 = vmul.f32 %v770_v41, %v69_v39  ;;  %v336_v39 = vld [vmem:[#allocation2 + $0x150] sm:$0xff]  ;;  %v334_v41 = vld [vmem:[#allocation2 + $0x140] sm:$0xff] }
 0x140   :  { %v77_v44 = vmul.f32 %v76_v40, %v72_v42  ;;  %v335_v40 = vld [vmem:[#allocation2 + $0x148] sm:$0xff]  ;;  %v333_v42 = vld [vmem:[#allocation2 + $0x138] sm:$0xff] }
 0x142   :  { %v82_v45 = vadd.f32 %v81_v43, %v77_v44  ;;  %v332_v43 = vld [vmem:[#allocation2 + $0x130] sm:$0xff]  ;;  %v331_v44 = vld [vmem:[#allocation2 + $0x128] sm:$0xff] }
 0x144   :  { %v83_v46 = vmax.f32 %v82_v45, 0.0  ;;  %v330_v45 = vld [vmem:[#allocation2 + $0x120] sm:$0xff] }
 0x146   :  { %v84_v47 = vmul.f32 %v83_v46, %v83_v46 }
 0x148   :  { %v85_v48 = vmul.f32 %v84_v47, %v83_v46  ;;  %v329_v46 = vld [vmem:[#allocation2 + $0x118] sm:$0xff]  ;;  %v328_v47 = vld [vmem:[#allocation2 + $0x110] sm:$0xff] }
 0x14a   :  { %653 = vmatmul.mubr.f32.vlgmr.msra.gmra.mxu0 %v85_v48  ;;  %v327_v48 = vld [vmem:[#allocation2 + $0x108] sm:$0xff] }
 0x14b   :  { %722 = vmatprep.mubr.msk.f32.mxu0 %vm849_vm0, %v848_v13  ;;  %691 = vmatpush3.msra.mxu0 %v341_v32 }
 0x14c   :  { %692 = vmatprep.subr.mxu0 %v848_v13 }
 0x14d   :  { %693 = vmatpush3.msra.mxu0 %v340_v33 }
 0x14e   :  { %694 = vmatprep.subr.mxu0 %v848_v13 }
 0x14f   :  { %695 = vmatpush3.msra.mxu0 %v339_v34  ;;  %v432_v34 = vrot.slane %v992_v3, %v919_v37 }
 0x150   :  { %696 = vmatprep.subr.mxu0 %v848_v13 }
 0x151   :  { %697 = vmatpush3.msra.mxu0 %v338_v35 }
 0x152   :  { %698 = vmatprep.subr.mxu0 %v848_v13 }
 0x153   :  { %699 = vmatpush3.msra.mxu0 %v337_v36 }
 0x154   :  { %700 = vmatprep.subr.mxu0 %v848_v13 }
 0x155   :  { %701 = vmatpush3.msra.mxu0 %v336_v39  ;;  %v437_v39 = vrot.slane %v992_v3, %v922_v38 }
 0x156   :  { %702 = vmatprep.subr.mxu0 %v848_v13 }
 0x157   :  { %703 = vmatpush3.msra.mxu0 %v335_v40 }
 0x158   :  { %704 = vmatprep.subr.mxu0 %v848_v13 }
 0x159   :  { %705 = vmatpush3.msra.mxu0 %v334_v41 }
 0x15a   :  { %706 = vmatprep.subr.mxu0 %v848_v13 }
 0x15b   :  { %707 = vmatpush3.msra.mxu0 %v333_v42 }
 0x15c   :  { %708 = vmatprep.subr.mxu0 %v848_v13 }
 0x15d   :  { %709 = vmatpush3.msra.mxu0 %v332_v43 }
 0x15e   :  { %710 = vmatprep.subr.mxu0 %v848_v13 }
 0x15f   :  { %711 = vmatpush3.msra.mxu0 %v331_v44 }
 0x160   :  { %712 = vmatprep.subr.mxu0 %v848_v13 }
 0x161   :  { %713 = vmatpush3.msra.mxu0 %v330_v45  ;;  %v443_v45 = vld [vmem:[#allocation5 + $0x20] sm:$0xff] }
 0x162   :  { %714 = vmatprep.subr.mxu0 %v848_v13 }
 0x163   :  { %715 = vmatpush3.msra.mxu0 %v329_v46  ;;  %v464_v46 = vrot.slane %v443_v45, %v886_v6 }
 0x164   :  { %716 = vmatprep.subr.mxu0 %v848_v13 }
 0x165   :  { %717 = vmatpush3.msra.mxu0 %v328_v47 }
 0x166   :  { %718 = vmatprep.subr.mxu0 %v848_v13 }
 0x167   :  { %719 = vmatpush3.msra.mxu0 %v327_v48 }
 0x168   :  { %720 = vmatprep.subr.mxu0 %v848_v13 }
 0x169   :  { %721 = vmatpush3.msra.mxu0 %v326_v49 }
 0x20a   :  { %v174_v51 = vpop.f32.mrf.mxu0 }
 0x20b   :  { %v935_v52 = vadd.f32 %v174_v51, %v107_v50 }
 0x20c   :  { %v654_v53 = vpop.f32.mrf.mxu0 }
 0x20d   :  { %178 = vadd.xlane.f32.xlu1 %v935_v52  ;;  %v180_v54 = vmul.f32 %v935_v52, %v935_v52 }
 0x211   :  { %181 = vadd.xlane.f32.xlu1 %v180_v54 }
 0x296   :  { %v179_v8 = vpop.xlane.xlu1 %178 }
 0x297   :  { %v183_v9 = vmul.f32 0.02, %v179_v8 }
 0x299   :  { %v185_v11 = vmul.f32 %v183_v9, %v183_v9  ;;  %v187_v17 = vsub.f32 %v935_v52, %v183_v9 }
 0x29a   :  { %v182_v10 = vpop.xlane.xlu1 %181 }
 0x29b   :  { %v184_v12 = vmul.f32 0.02, %v182_v10  ;;  %v460_v10 = vld [vmem:[#allocation2 + $0x1f8] sm:$0xff] }
 0x29d   :  { %v186_v14 = vsub.f32 %v184_v12, %v185_v11  ;;  %v459_v11 = vld [vmem:[#allocation2 + $0x1f0] sm:$0xff]  ;;  %v458_v12 = vld [vmem:[#allocation2 + $0x1e8] sm:$0xff] }
 0x29f   :  { %v188_v15 = vadd.f32 1e-05, %v186_v14  ;;  %v457_v14 = vld [vmem:[#allocation2 + $0x1e0] sm:$0xff] }
 0x2a1   :  { %771 = vrsqrt.f32 %v188_v15  ;;  %v456_v15 = vld [vmem:[#allocation2 + $0x1d8] sm:$0xff] }
 0x2ae   :  { %v772_v18 = vpop.eup %771 }
 0x2af   :  { %v190_v20 = vmul.f32 %v772_v18, %v187_v17  ;;  %v454_v17 = vld [vmem:[#allocation2 + $0x1c8] sm:$0xff]  ;;  %v453_v18 = vld [vmem:[#allocation2 + $0x1c0] sm:$0xff] }
 0x2b1   :  { %v195_v21 = vmul.f32 %v194_v16, %v190_v20  ;;  %v455_v16 = vld [vmem:[#allocation2 + $0x1d0] sm:$0xff] }
 0x2b2   :  { %v451_v20 = vld [vmem:[#allocation2 + $0x1b0] sm:$0xff] }
 0x2b3   :  { %v200_v22 = vadd.f32 %v199_v19, %v195_v21  ;;  %v452_v19 = vld [vmem:[#allocation2 + $0x1b8] sm:$0xff]  ;;  %v450_v21 = vld [vmem:[#allocation2 + $0x1a8] sm:$0xff] }
 0x2b5   :  { %v201_v23 = vmax.f32 %v200_v22, 0.0  ;;  %v449_v22 = vld [vmem:[#allocation2 + $0x1a0] sm:$0xff] }
 0x2b7   :  { %v202_v24 = vmul.f32 %v201_v23, %v201_v23 }
 0x2b9   :  { %v203_v25 = vmul.f32 %v202_v24, %v201_v23  ;;  %v448_v23 = vld [vmem:[#allocation2 + $0x198] sm:$0xff]  ;;  %v447_v24 = vld [vmem:[#allocation2 + $0x190] sm:$0xff] }
 0x2bb   :  { %688 = vmatmul.mubr.f32.vlgmr.msra.gmra.mxu1 %v203_v25  ;;  %v446_v25 = vld [vmem:[#allocation2 + $0x188] sm:$0xff] }
 0x2bc   :  { %757 = vmatprep.mubr.msk.f32.mxu1 %vm849_vm0, %v848_v13  ;;  %726 = vmatpush3.msra.mxu1 %v460_v10 }
 0x2bd   :  { %727 = vmatprep.subr.mxu1 %v848_v13 }
 0x2be   :  { %728 = vmatpush3.msra.mxu1 %v459_v11 }
 0x2bf   :  { %729 = vmatprep.subr.mxu1 %v848_v13 }
 0x2c0   :  { %730 = vmatpush3.msra.mxu1 %v458_v12 }
 0x2c1   :  { %731 = vmatprep.subr.mxu1 %v848_v13 }
 0x2c2   :  { %732 = vmatpush3.msra.mxu1 %v457_v14 }
 0x2c3   :  { %733 = vmatprep.subr.mxu1 %v848_v13 }
 0x2c4   :  { %734 = vmatpush3.msra.mxu1 %v456_v15 }
 0x2c5   :  { %735 = vmatprep.subr.mxu1 %v848_v13 }
 0x2c6   :  { %736 = vmatpush3.msra.mxu1 %v455_v16 }
 0x2c7   :  { %737 = vmatprep.subr.mxu1 %v848_v13 }
 0x2c8   :  { %738 = vmatpush3.msra.mxu1 %v454_v17 }
 0x2c9   :  { %739 = vmatprep.subr.mxu1 %v848_v13 }
 0x2ca   :  { %740 = vmatpush3.msra.mxu1 %v453_v18 }
 0x2cb   :  { %741 = vmatprep.subr.mxu1 %v848_v13 }
 0x2cc   :  { %742 = vmatpush3.msra.mxu1 %v452_v19 }
 0x2cd   :  { %743 = vmatprep.subr.mxu1 %v848_v13 }
 0x2ce   :  { %744 = vmatpush3.msra.mxu1 %v451_v20 }
 0x2cf   :  { %745 = vmatprep.subr.mxu1 %v848_v13 }
 0x2d0   :  { %746 = vmatpush3.msra.mxu1 %v450_v21 }
 0x2d1   :  { %747 = vmatprep.subr.mxu1 %v848_v13 }
 0x2d2   :  { %748 = vmatpush3.msra.mxu1 %v449_v22 }
 0x2d3   :  { %749 = vmatprep.subr.mxu1 %v848_v13 }
 0x2d4   :  { %750 = vmatpush3.msra.mxu1 %v448_v23 }
 0x2d5   :  { %751 = vmatprep.subr.mxu1 %v848_v13 }
 0x2d6   :  { %752 = vmatpush3.msra.mxu1 %v447_v24 }
 0x2d7   :  { %753 = vmatprep.subr.mxu1 %v848_v13 }
 0x2d8   :  { %754 = vmatpush3.msra.mxu1 %v446_v25 }
 0x2d9   :  { %755 = vmatprep.subr.mxu1 %v848_v13 }
 0x2da   :  { %756 = vmatpush3.msra.mxu1 %v445_v26 }
 0x37b   :  { %v293_v28 = vpop.f32.mrf.mxu1 }
 0x37c   :  { %v967_v29 = vadd.f32 %v293_v28, %v226_v27 }
 0x37d   :  { %v689_v30 = vpop.f32.mrf.mxu1 }
 0x37e   :  { %297 = vadd.xlane.f32.xlu1 %v967_v29  ;;  %v299_v31 = vmul.f32 %v967_v29, %v967_v29 }
 0x382   :  { %300 = vadd.xlane.f32.xlu1 %v299_v31 }
 0x407   :  { %v298_v50 = vpop.xlane.xlu1 %297 }
 0x408   :  { %v302_v51 = vmul.f32 0.02, %v298_v50 }
 0x40a   :  { %v304_v53 = vmul.f32 %v302_v51, %v302_v51  ;;  %v306_v58 = vsub.f32 %v967_v29, %v302_v51 }
 0x40b   :  { %v301_v52 = vpop.xlane.xlu1 %300 }
 0x40c   :  { %v303_v54 = vmul.f32 0.02, %v301_v52 }
 0x40e   :  { %v305_v55 = vsub.f32 %v303_v54, %v304_v53 }
 0x410   :  { %v307_v56 = vadd.f32 1e-05, %v305_v55 }
 0x412   :  { %773 = vrsqrt.f32 %v307_v56 }
 0x41f   :  { %v774_v59 = vpop.eup %773 }
 0x420   :  { %v309_v61 = vmul.f32 %v774_v59, %v306_v58 }
 0x422   :  { %v314_v62 = vmul.f32 %v313_v57, %v309_v61 }
 0x424   :  { %v319_v63 = vadd.f32 %v318_v60, %v314_v62 }
 0x426   :  { %v320_v0 = vmax.f32 %v319_v63, 0.0 }
 0x428   :  { %v321_v1 = vmul.f32 %v320_v0, %v320_v0 }
 0x42a   :  { %v322_v2 = vmul.f32 %v321_v1, %v320_v0 }
 0x42c   :  { %723 = vmatmul.mubr.f32.vlgmr.msra.gmra.mxu0 %v322_v2 }
 0x4ec   :  { %v412_v5 = vpop.f32.mrf.mxu0 }
 0x4ed   :  { %v996_v7 = vadd.f32 %v412_v5, %v345_v4 }
 0x4ee   :  { %v724_v8 = vpop.f32.mrf.mxu0 }
 0x4ef   :  { %416 = vadd.xlane.f32.xlu1 %v996_v7  ;;  %v418_v9 = vmul.f32 %v996_v7, %v996_v7 }
 0x4f3   :  { %419 = vadd.xlane.f32.xlu1 %v418_v9 }
 0x578   :  { %v417_v27 = vpop.xlane.xlu1 %416 }
 0x579   :  { %v421_v28 = vmul.f32 0.02, %v417_v27 }
 0x57b   :  { %v423_v30 = vmul.f32 %v421_v28, %v421_v28  ;;  %v425_v35 = vsub.f32 %v996_v7, %v421_v28 }
 0x57c   :  { %v420_v29 = vpop.xlane.xlu1 %419 }
 0x57d   :  { %v422_v31 = vmul.f32 0.02, %v420_v29 }
 0x57f   :  { %v424_v32 = vsub.f32 %v422_v31, %v423_v30 }
 0x581   :  { %v426_v33 = vadd.f32 1e-05, %v424_v32 }
 0x583   :  { %775 = vrsqrt.f32 %v426_v33 }
 0x590   :  { %v776_v36 = vpop.eup %775 }
 0x591   :  { %v428_v40 = vmul.f32 %v776_v36, %v425_v35 }
 0x593   :  { %v433_v13 = vmul.f32 %v432_v34, %v428_v40 }
 0x595   :  { %v438_v41 = vadd.f32 %v437_v39, %v433_v13 }
 0x597   :  { %v439_v42 = vmax.f32 %v438_v41, 0.0 }
 0x599   :  { %v440_v43 = vmul.f32 %v439_v42, %v439_v42 }
 0x59b   :  { %v441_v44 = vmul.f32 %v440_v43, %v439_v42 }
 0x59d   :  { %758 = vmatmul.mubr.f32.vlgmr.msra.gmra.mxu1 %v441_v44 }
 0x65d   :  { %v531_v47 = vpop.f32.mrf.mxu1 }
 0x65e   :  { %v532_v37 = vadd.f32 %v531_v47, %v464_v46 }
 0x65f   :  { %v759_v48 = vpop.f32.mrf.mxu1 }
 0x660   :  { %535 = vst [vmem:[#allocation7] sm:$0xff] %v532_v37 }
 0x661   :  { %828 = shalt.err (!%p825_p0)
}
 0x662   :  { %545 = dma.vmem_to_hbm [thread:$0]  %s543_s2, 128, %s1028_s3, [#allocation4]  }
 0x663   :  { %841 = dma.done.wait [#allocation4], 128  }
 0x664   :  { %842 = vsyncadd [#allocation4], 4294967168 }
 0x665   :  { %549 = vsyncpa [#allocation3], 1 }
 0x666   :  { %550 = vsyncpa [#allocation6], 1 }
 0x667   :  { %551 = vsyncpa [#allocation4], 1 }

</bundles_post_ra>
